<compile_context>
chip_gen: v7x
topology: tpu7x:2x2x1
jax: 0.10.0
libtpu: 0.0.40
codegen_flags: <defaults>
</compile_context>

<pallas_src>
import functools

import jax
import jax.numpy as jnp
from jax import lax
from jax.experimental import pallas as pl
from jax.experimental.pallas import tpu as pltpu

LANES = 128  # all intermediate / output feature widths are padded to this (lane-dense)


def gcn_vae_kernel(x_ref, adj_ref, wpack_ref, bsd_ref, logit_ref, mulv_ref,
                   *, F, RA, RB, RC, RD):
    f32, bf16 = jnp.float32, jnp.bfloat16

    # In-kernel casts (review: avoid wrapper-side pre-cast anti-pattern).
    x = x_ref[...].astype(bf16)      # (N, F)
    adj = adj_ref[...].astype(bf16)  # (N, N)

    # Static sublane slices of the packed bf16 weight buffer; all starts are multiples of 16.
    w1 = wpack_ref[0:F, :]           # (F, 128)   W1 (lanes >= HD1 zero)
    w23 = wpack_ref[RA:RA + LANES, :]   # (128,128) rows 0:HD1 = [W2 | W3], rest zero
    wsd = wpack_ref[RB:RB + LANES, :]   # (128,128) rows 0:HD2 = [Wsrc | Wdst], rest zero
    ws_rep = wpack_ref[RC:RC + LANES, :]  # (128,128) rows 0:DEC = w_all (lane-replicated),
    #                                        row 2*DEC = b_all (lane-replicated), rest zero
    wd_row = wpack_ref[RD:RD + 1, :]    # (1, 128)  lanes DEC:2*DEC = w_all, rest zero

    bsd = bsd_ref[...]               # (1, 128) f32: [b_src | b_dst | 1.0(bias lane) | 0]

    # ---- gc1: hidden1 = relu(adj @ (x @ W1))   (eval mode: dropout = identity)
    s1 = jnp.dot(x, w1, preferred_element_type=f32)                          # (N, 128)
    h1 = jnp.maximum(jnp.dot(adj, s1.astype(bf16),
                             preferred_element_type=f32), 0.0)               # (N, 128)

    # ---- gc2/gc3 fused: [mu | logvar | 0] = adj @ (h1 @ [W2 | W3 | 0])
    s23 = jnp.dot(h1.astype(bf16), w23, preferred_element_type=f32)          # (N, 128)
    mulv = jnp.dot(adj, s23.astype(bf16), preferred_element_type=f32)        # (N, 128)
    mulv_ref[...] = mulv                                                     # lane-dense store

    # ---- reparameterize: eval mode -> z = mu (mu lanes of mulv; wsd's logvar rows are zero)
    # TODO(synk): training-mode path (z = mu + exp(logvar)*randn) would use
    # pltpu.prng_seed / pltpu.stateful_normal; eval mode is deterministic.

    # ---- ElementSumLayer decoder (num_class = 1), fused src/dst projection.
    # Lane 2*DEC of bsd is 1.0 with a zero weight column -> src_dst carries a constant-1
    # "bias lane" that folds b_all into the ws_rep matmul below.
    src_dst = jnp.maximum(
        jnp.dot(mulv.astype(bf16), wsd, preferred_element_type=f32) + bsd, 0.0)  # (N, 128)
    sdb = src_dst.astype(bf16)

    # s_rep[i, j] = w_all . src[i] + b_all  for every lane j  (MXU broadcast, b_all folded)
    s_rep = jnp.dot(sdb, ws_rep, preferred_element_type=f32)                 # (N, 128)
    # d[j] = w_all . dst[j]
    d = lax.dot_general(wd_row, sdb, (((1,), (1,)), ((), ())),
                        preferred_element_type=f32)                          # (1, N)

    n = logit_ref.shape[1]
    reps = n // LANES
    s_full = s_rep if reps == 1 else jnp.tile(s_rep, (1, reps))
    logit_ref[...] = s_full + d                                              # (N, N) logits


def pack_params(params):
    """One-time packing of all weights/biases into two kernel inputs (hoisted per review)."""
    f32, bf16 = jnp.float32, jnp.bfloat16
    F, HD1 = params["w1"].shape
    HD2 = params["w2"].shape[1]
    DEC = params["wsrc_t"].shape[1]
    assert HD1 <= LANES and 2 * HD2 <= LANES and 2 * DEC + 1 <= LANES

    def rup16(v):  # bf16 sublane-tile alignment for static row-slice starts
        return (v + 15) // 16 * 16

    RA = rup16(F)
    RB = RA + LANES
    RC = RB + LANES
    RD = RC + LANES
    rows = rup16(RD + 1)

    wall = params["wall_t"][:, 0]  # (DEC,)

    wpack = jnp.zeros((rows, LANES), f32)
    wpack = wpack.at[0:F, 0:HD1].set(params["w1"])
    wpack = wpack.at[RA:RA + HD1, 0:HD2].set(params["w2"])
    wpack = wpack.at[RA:RA + HD1, HD2:2 * HD2].set(params["w3"])
    wpack = wpack.at[RB:RB + HD2, 0:DEC].set(params["wsrc_t"])
    wpack = wpack.at[RB:RB + HD2, DEC:2 * DEC].set(params["wdst_t"])
    wpack = wpack.at[RC:RC + DEC, :].set(jnp.broadcast_to(wall[:, None], (DEC, LANES)))
    wpack = wpack.at[RC + 2 * DEC, :].set(params["ball"][0, 0])   # b_all on the bias-lane row
    wpack = wpack.at[RD, DEC:2 * DEC].set(wall)
    wpack = wpack.astype(bf16)

    # f32 decoder bias row: [b_src | b_dst | 1.0 (bias lane) | zeros]
    bsd = jnp.zeros((1, LANES), f32)
    bsd = bsd.at[0, 0:DEC].set(params["bsrc"][0])
    bsd = bsd.at[0, DEC:2 * DEC].set(params["bdst"][0])
    bsd = bsd.at[0, 2 * DEC].set(1.0)

    meta = dict(F=F, HD1=HD1, HD2=HD2, DEC=DEC, RA=RA, RB=RB, RC=RC, RD=RD)
    return dict(wpack=wpack, bsd=bsd, meta=meta)


def gcn_vae_forward(x, adj, packed):
    f32 = jnp.float32
    meta = packed["meta"]
    N, F = x.shape
    HD2 = meta["HD2"]
    assert F == meta["F"]
    # Single-program whole-array kernel (toy path); see TODO(synk) at top for large-N grid.
    assert N % LANES == 0, "toy single-program path assumes N is a multiple of 128"

    kernel = functools.partial(gcn_vae_kernel, F=meta["F"], RA=meta["RA"],
                               RB=meta["RB"], RC=meta["RC"], RD=meta["RD"])

    flops = 2 * N * (F * LANES + N * LANES + LANES * LANES
                     + N * LANES + LANES * LANES + LANES * LANES) + 2 * N * LANES
    bytes_accessed = (x.size * 4 + adj.size * 4 + packed["wpack"].size * 2
                      + packed["bsd"].size * 4 + N * N * 4 + N * LANES * 4)
    cost = pl.CostEstimate(flops=flops, transcendentals=0, bytes_accessed=bytes_accessed)

    vmem = pl.BlockSpec(memory_space=pltpu.MemorySpace.VMEM)
    logits_mat, mulv = pl.pallas_call(
        kernel,
        out_shape=(
            jax.ShapeDtypeStruct((N, N), f32),      # pairwise link logits (lane-dense)
            jax.ShapeDtypeStruct((N, LANES), f32),  # [mu | logvar | pad] (lane-dense)
        ),
        in_specs=[vmem] * 4,
        out_specs=(vmem, vmem),
        cost_estimate=cost,
    )(x, adj, packed["wpack"], packed["bsd"])

    mu = mulv[:, :HD2]
    logvar = mulv[:, HD2:2 * HD2]
    link_logits = logits_mat.reshape(N * N, 1)
    # eval mode: z == mu, so recovered == link_logits (aliased, no second decoder pass / store)
    recovered = link_logits
    return link_logits, mu, logvar, recovered


def reference_forward_bf16(x, adj, p):
    """Pure-JAX reference with the same bf16-operand / f32-accumulate policy as the kernel."""
    f32, bf16 = jnp.float32, jnp.bfloat16
    dotf = functools.partial(jnp.dot, preferred_element_type=f32)
    xb, ab = x.astype(bf16), adj.astype(bf16)
    s1 = dotf(xb, p["w1"].astype(bf16))
    h1 = jnp.maximum(dotf(ab, s1.astype(bf16)), 0.0)
    mu = dotf(ab, dotf(h1.astype(bf16), p["w2"].astype(bf16)).astype(bf16))
    logvar = dotf(ab, dotf(h1.astype(bf16), p["w3"].astype(bf16)).astype(bf16))
    zb = mu.astype(bf16)
    src = jnp.maximum(dotf(zb, p["wsrc_t"].astype(bf16)) + p["bsrc"], 0.0)
    dst = jnp.maximum(dotf(zb, p["wdst_t"].astype(bf16)) + p["bdst"], 0.0)
    wall_b = p["wall_t"].astype(bf16)
    s = dotf(src.astype(bf16), wall_b)
    d = dotf(dst.astype(bf16), wall_b)
    ball_b = p["ball"].astype(bf16).astype(f32)
    logits = (s + d.T + ball_b).reshape(-1, 1)
    return logits, mu, logvar, logits


def reference_forward_f32(x, adj, p):
    h1 = jnp.maximum(adj @ (x @ p["w1"]), 0.0)
    mu = adj @ (h1 @ p["w2"])
    logvar = adj @ (h1 @ p["w3"])
    z = mu
    src = jnp.maximum(z @ p["wsrc_t"] + p["bsrc"], 0.0)
    dst = jnp.maximum(z @ p["wdst_t"] + p["bdst"], 0.0)
    s = src @ p["wall_t"]
    d = dst @ p["wall_t"]
    logits = (s + d.T + p["ball"]).reshape(-1, 1)
    return logits, mu, logvar, logits


def init_params(key, input_feat_dim, hidden_dim1, hidden_dim2, dec_hidden=16, num_class=1):
    ks = jax.random.split(key, 9)
    p = {}
    # GraphConvolution weights: (in, out)
    p["w1"] = 0.1 * jax.random.normal(ks[0], (input_feat_dim, hidden_dim1), jnp.float32)
    p["w2"] = 0.1 * jax.random.normal(ks[1], (hidden_dim1, hidden_dim2), jnp.float32)
    p["w3"] = 0.1 * jax.random.normal(ks[2], (hidden_dim1, hidden_dim2), jnp.float32)
    # ElementSumLayer(hidden_dim2, 16, 1): nn.Linear weights are (out, in); pre-transpose.
    p["wsrc_t"] = (0.1 * jax.random.normal(ks[3], (dec_hidden, hidden_dim2), jnp.float32)).T
    p["bsrc"] = 0.1 * jax.random.normal(ks[4], (1, dec_hidden), jnp.float32)
    p["wdst_t"] = (0.1 * jax.random.normal(ks[5], (dec_hidden, hidden_dim2), jnp.float32)).T
    p["bdst"] = 0.1 * jax.random.normal(ks[6], (1, dec_hidden), jnp.float32)
    p["wall_t"] = (0.1 * jax.random.normal(ks[7], (num_class, dec_hidden), jnp.float32)).T
    p["ball"] = 0.1 * jax.random.normal(ks[8], (1, num_class), jnp.float32)
    return p


if __name__ == "__main__":
    # Small, TPU-friendly shapes
    N, F, HD1, HD2 = 128, 64, 32, 16

    key = jax.random.PRNGKey(0)
    kx, ka, kp = jax.random.split(key, 3)

    x = jax.random.normal(kx, (N, F), jnp.float32)

    # deterministic symmetric adjacency with self-loops, sym-normalized (glue in JAX)
    a = (jax.random.uniform(ka, (N, N)) < 0.05).astype(jnp.float32)
    a = jnp.maximum(a, a.T) + jnp.eye(N, dtype=jnp.float32)
    deg_inv_sqrt = 1.0 / jnp.sqrt(a.sum(axis=1))
    adj = deg_inv_sqrt[:, None] * a * deg_inv_sqrt[None, :]

    params = init_params(kp, F, HD1, HD2)
    packed = pack_params(params)   # one-time packing, hoisted out of the per-call path

    forward = jax.jit(functools.partial(gcn_vae_forward, packed=packed))
    outs = jax.block_until_ready(forward(x, adj))
    link_logits, mu, logvar, recovered = outs

    # exactness check vs a pure-JAX reference using the same mixed-precision policy
    ref_b = reference_forward_bf16(x, adj, params)
    for got, exp in zip(outs, ref_b):
        assert got.shape == exp.shape, (got.shape, exp.shape)
        assert jnp.allclose(got, exp, rtol=1e-2, atol=5e-3), float(jnp.max(jnp.abs(got - exp)))

    # mixed-precision drift check vs the full-f32 reference
    ref_f = reference_forward_f32(x, adj, params)
    for got, exp in zip(outs, ref_f):
        assert jnp.allclose(got, exp, rtol=5e-2, atol=3e-2), float(jnp.max(jnp.abs(got - exp)))

    assert link_logits.shape == (N * N, 1)
    assert mu.shape == (N, HD2) and logvar.shape == (N, HD2)
    assert recovered.shape == (N * N, 1)

    print("KERNEL_OK")
</pallas_src>

<mosaic_0001>
module attributes {stable_mosaic.version = 11 : i64} {
  func.func @gcn_vae_kernel(%arg0: memref<128x64xf32, #tpu.memory_space<vmem>>, %arg1: memref<128x128xf32, #tpu.memory_space<vmem>>, %arg2: memref<464x128xbf16, #tpu.memory_space<vmem>>, %arg3: memref<1x128xf32, #tpu.memory_space<vmem>>, %arg4: memref<128x128xf32, #tpu.memory_space<vmem>>, %arg5: memref<128x128xf32, #tpu.memory_space<vmem>>) attributes {dimension_semantics = [], scalar_prefetch = 0 : i64, scratch_operands = 0 : i64, tpu.core_type = #tpu.core_type<tc>} {
    %c0 = arith.constant 0 : index
    %c0_0 = arith.constant 0 : index
    %0 = vector.load %arg0[%c0, %c0_0] : memref<128x64xf32, #tpu.memory_space<vmem>>, vector<128x64xf32>
    %1 = arith.truncf %0 : vector<128x64xf32> to vector<128x64xbf16>
    %c0_1 = arith.constant 0 : index
    %c0_2 = arith.constant 0 : index
    %2 = vector.load %arg1[%c0_1, %c0_2] : memref<128x128xf32, #tpu.memory_space<vmem>>, vector<128x128xf32>
    %3 = arith.truncf %2 : vector<128x128xf32> to vector<128x128xbf16>
    %c0_3 = arith.constant 0 : index
    %c0_4 = arith.constant 0 : index
    %4 = vector.load %arg2[%c0_3, %c0_4] : memref<464x128xbf16, #tpu.memory_space<vmem>>, vector<64x128xbf16>
    %c64 = arith.constant 64 : index
    %c0_5 = arith.constant 0 : index
    %5 = vector.load %arg2[%c64, %c0_5] : memref<464x128xbf16, #tpu.memory_space<vmem>>, vector<128x128xbf16>
    %c192 = arith.constant 192 : index
    %c0_6 = arith.constant 0 : index
    %6 = vector.load %arg2[%c192, %c0_6] : memref<464x128xbf16, #tpu.memory_space<vmem>>, vector<128x128xbf16>
    %c320 = arith.constant 320 : index
    %c0_7 = arith.constant 0 : index
    %7 = vector.load %arg2[%c320, %c0_7] : memref<464x128xbf16, #tpu.memory_space<vmem>>, vector<128x128xbf16>
    %c448 = arith.constant 448 : index
    %c0_8 = arith.constant 0 : index
    %8 = vector.load %arg2[%c448, %c0_8] : memref<464x128xbf16, #tpu.memory_space<vmem>>, vector<1x128xbf16>
    %c0_9 = arith.constant 0 : index
    %c0_10 = arith.constant 0 : index
    %9 = vector.load %arg3[%c0_9, %c0_10] : memref<1x128xf32, #tpu.memory_space<vmem>>, vector<1x128xf32>
    %cst = arith.constant dense<0.000000e+00> : vector<128x128xf32>
    %10 = tpu.matmul %1, %4, %cst {dimension_numbers = #tpu.dot_dimension_numbers<[1], [0], [0], [1], [0, 0, 1, 1], [], []>} : vector<128x64xbf16>, vector<64x128xbf16>, vector<128x128xf32> -> vector<128x128xf32>
    %11 = arith.truncf %10 : vector<128x128xf32> to vector<128x128xbf16>
    %cst_11 = arith.constant dense<0.000000e+00> : vector<128x128xf32>
    %12 = tpu.matmul %3, %11, %cst_11 {dimension_numbers = #tpu.dot_dimension_numbers<[1], [0], [0], [1], [0, 0, 1, 1], [], []>} : vector<128x128xbf16>, vector<128x128xbf16>, vector<128x128xf32> -> vector<128x128xf32>
    %cst_12 = arith.constant 0.000000e+00 : f32
    %13 = vector.broadcast %cst_12 : f32 to vector<128x128xf32>
    %14 = arith.maximumf %12, %13 : vector<128x128xf32>
    %15 = arith.truncf %14 : vector<128x128xf32> to vector<128x128xbf16>
    %cst_13 = arith.constant dense<0.000000e+00> : vector<128x128xf32>
    %16 = tpu.matmul %15, %5, %cst_13 {dimension_numbers = #tpu.dot_dimension_numbers<[1], [0], [0], [1], [0, 0, 1, 1], [], []>} : vector<128x128xbf16>, vector<128x128xbf16>, vector<128x128xf32> -> vector<128x128xf32>
    %17 = arith.truncf %16 : vector<128x128xf32> to vector<128x128xbf16>
    %cst_14 = arith.constant dense<0.000000e+00> : vector<128x128xf32>
    %18 = tpu.matmul %3, %17, %cst_14 {dimension_numbers = #tpu.dot_dimension_numbers<[1], [0], [0], [1], [0, 0, 1, 1], [], []>} : vector<128x128xbf16>, vector<128x128xbf16>, vector<128x128xf32> -> vector<128x128xf32>
    %c0_15 = arith.constant 0 : index
    %c0_16 = arith.constant 0 : index
    %19 = vector.load %arg5[%c0_15, %c0_16] : memref<128x128xf32, #tpu.memory_space<vmem>>, vector<128x128xf32>
    tpu.vector_store %arg5[%c0_15, %c0_16], %18 {strides = array<i32>} : memref<128x128xf32, #tpu.memory_space<vmem>>, vector<128x128xf32>,
    %20 = arith.truncf %18 : vector<128x128xf32> to vector<128x128xbf16>
    %cst_17 = arith.constant dense<0.000000e+00> : vector<128x128xf32>
    %21 = tpu.matmul %20, %6, %cst_17 {dimension_numbers = #tpu.dot_dimension_numbers<[1], [0], [0], [1], [0, 0, 1, 1], [], []>} : vector<128x128xbf16>, vector<128x128xbf16>, vector<128x128xf32> -> vector<128x128xf32>
    %22 = vector.broadcast %9 : vector<1x128xf32> to vector<128x128xf32>
    %23 = arith.addf %21, %22 : vector<128x128xf32>
    %cst_18 = arith.constant 0.000000e+00 : f32
    %24 = vector.broadcast %cst_18 : f32 to vector<128x128xf32>
    %25 = arith.maximumf %23, %24 : vector<128x128xf32>
    %26 = arith.truncf %25 : vector<128x128xf32> to vector<128x128xbf16>
    %cst_19 = arith.constant dense<0.000000e+00> : vector<128x128xf32>
    %27 = tpu.matmul %26, %7, %cst_19 {dimension_numbers = #tpu.dot_dimension_numbers<[1], [0], [0], [1], [0, 0, 1, 1], [], []>} : vector<128x128xbf16>, vector<128x128xbf16>, vector<128x128xf32> -> vector<128x128xf32>
    %cst_20 = arith.constant dense<0.000000e+00> : vector<1x128xf32>
    %28 = tpu.matmul %8, %26, %cst_20 {dimension_numbers = #tpu.dot_dimension_numbers<[1], [1], [0], [0], [0, 0, 1, 0], [], []>} : vector<1x128xbf16>, vector<128x128xbf16>, vector<1x128xf32> -> vector<1x128xf32>
    %29 = vector.broadcast %28 : vector<1x128xf32> to vector<128x128xf32>
    %30 = arith.addf %27, %29 : vector<128x128xf32>
    %c0_21 = arith.constant 0 : index
    %c0_22 = arith.constant 0 : index
    %31 = vector.load %arg4[%c0_21, %c0_22] : memref<128x128xf32, #tpu.memory_space<vmem>>, vector<128x128xf32>
    tpu.vector_store %arg4[%c0_21, %c0_22], %30 {strides = array<i32>} : memref<128x128xf32, #tpu.memory_space<vmem>>, vector<128x128xf32>,
    return
  }
}

</mosaic_0001>

<bundles_post_ra>
// kernel: gcn_vae_forward.1
= control target key start
LH: loop header
LB: loop body
LE: loop exit
PB: predicated region body
PF: predicated region fallthrough
CT: control target
= control target key end

     0   :  { %11 = vsyncpa [#allocation3], 0  ;;  %s1477_s18 = smov [#allocation2]   ;;  %s1786_s0 = inlined_call_operand.vmem [shape: f32[128,64], index: 0, kind: input, shape index: {}]   ;;  %s1787_s1 = inlined_call_operand.vmem [shape: f32[128,128], index: 1, kind: input, shape index: {}]   ;;  %s1788_s2 = inlined_call_operand.hbm [shape: bf16[464,128], index: 2, kind: input, shape index: {}]   ;;  %s1789_s3 = inlined_call_operand.vmem [shape: f32[1,128], index: 3, kind: input, shape index: {}]   ;;  %s1790_s4 = inlined_call_operand.vmem [shape: f32[128,128], index: 4, kind: output, shape index: {0}]   ;;  %s1791_s5 = inlined_call_operand.vmem [shape: f32[128,128], index: 5, kind: output, shape index: {1}]  }
   0x1   :  { %s21_s19 = sshll.u32 %s1477_s18, 4  ;;  %s1453_s22 = scalar_lea.hbm %s1788_s2, 3712  ;;  %s22_s19 = int_to_ptr.vmem [resolvable:$true] %s21_s19 }
   0x2   :  { %p1454_p0 = scmp.ne.s32.totalorder %s1788_s2, %s1453_s22  ;;  %p1457_p1 = scmp.lt.u32.totalorder %s1453_s22, %s1788_s2 }
   0x4   :  { %p1459_p2 = pnand %p1457_p1, %p1454_p0 }
   0x6   :  { %1462 = shalt.err (!%p1459_p2)
}
   0x7   :  { %s1463_s27 = scalar_lea.vmem %s22_s19, 3712  ;;  %p1468_p4 = scmp.lt.s32.totalorder %s22_s19, %s22_s19 }
   0x8   :  { %p1464_p3 = scmp.ne.s32.totalorder %s22_s19, %s1463_s27  ;;  %p1469_p5 = scmp.lt.s32.totalorder %s1463_s27, %s1463_s27 }
   0xa   :  { %p1470_p6 = por %p1469_p5, %p1468_p4 }
   0xc   :  { %p1471_p7 = pnand %p1470_p6, %p1464_p3 }
   0xe   :  { %1474 = shalt.err (!%p1471_p7)
}
   0xf   :  { %s1478_s28 = smov 64   ;;  %s1479_s29 = smov 4  }
  0x10   :  { %27 = dma.hbm_to_vmem [thread:$0]  %s1788_s2, 3712, %s22_s19, [#allocation3], %s1478_s28, %s1478_s28, %s1479_s29  }
  0x11   :  { %1475 = dma.done.wait [#allocation3], 3712  }
  0x12   :  { %1476 = vsyncadd [#allocation3], 4294963584  ;;  %v1425_v0 = vld [vmem:[#allocation2] sm:$0xff]   ;;  %v1426_v1 = vld [vmem:[#allocation2 + $0x8] sm:$0xff]   ;;  %vm164_vm0 = vcmask 523264   ;;  %vm1481_vm1 = vmmov 0  }
  0x13   :  { %1216 = vmatprep.subr.bf16.mxu0 %v1425_v0  ;;  %v1427_v2 = vld [vmem:[#allocation2 + $0x10] sm:$0xff]   ;;  %v34_v3 = vld [vmem:[%s1786_s0] sm:$0xff]  ;;  %v35_v4 = vld [vmem:[%s1786_s0 + $0x8] sm:$0xff] }
  0x14   :  { %1217 = vmatpush3.bf16.msra.mxu0 %v1425_v0  ;;  %v50_v5 = vpack.c.bf16 %v35_v4, %v34_v3  ;;  %v1428_v6 = vld [vmem:[#allocation2 + $0x18] sm:$0xff]   ;;  %v36_v7 = vld [vmem:[%s1786_s0 + $0x10] sm:$0xff]  ;;  %v38_v9 = vld [vmem:[%s1786_s0 + $0x20] sm:$0xff] }
  0x15   :  { %1218 = vmatprep.subr.bf16.mxu0 %v1426_v1  ;;  %v37_v8 = vld [vmem:[%s1786_s0 + $0x18] sm:$0xff]  ;;  %v39_v10 = vld [vmem:[%s1786_s0 + $0x28] sm:$0xff]  ;;  %v40_v13 = vld [vmem:[%s1786_s0 + $0x30] sm:$0xff] }
  0x16   :  { %1224 = vmatprep.mubr.msk.bf16.mxu0 %vm164_vm0, %v50_v5  ;;  %v51_v11 = vpack.c.bf16 %v37_v8, %v36_v7  ;;  %v52_v12 = vpack.c.bf16 %v39_v10, %v38_v9  ;;  %v41_v14 = vld [vmem:[%s1786_s0 + $0x38] sm:$0xff]  ;;  %v42_v15 = vld [vmem:[%s1786_s0 + $0x40] sm:$0xff]  ;;  %v43_v16 = vld [vmem:[%s1786_s0 + $0x48] sm:$0xff] }
  0x17   :  { %v53_v17 = vpack.c.bf16 %v41_v14, %v40_v13  ;;  %v54_v18 = vpack.c.bf16 %v43_v16, %v42_v15  ;;  %v44_v19 = vld [vmem:[%s1786_s0 + $0x50] sm:$0xff]  ;;  %v45_v20 = vld [vmem:[%s1786_s0 + $0x58] sm:$0xff]  ;;  %v46_v21 = vld [vmem:[%s1786_s0 + $0x60] sm:$0xff] }
  0x18   :  { %1219 = vmatpush3.bf16.msra.mxu0 %v1426_v1  ;;  %v47_v22 = vld [vmem:[%s1786_s0 + $0x68] sm:$0xff]  ;;  %v55_v23 = vpack.c.bf16 %v45_v20, %v44_v19  ;;  %v48_v25 = vld [vmem:[%s1786_s0 + $0x70] sm:$0xff]  ;;  %v49_v26 = vld [vmem:[%s1786_s0 + $0x78] sm:$0xff] }
  0x19   :  { %1220 = vmatprep.subr.bf16.mxu0 %v1427_v2  ;;  %v56_v24 = vpack.c.bf16 %v47_v22, %v46_v21  ;;  %v57_v27 = vpack.c.bf16 %v49_v26, %v48_v25  ;;  %v58_v28 = vld [vmem:[%s1787_s1] sm:$0xff]  ;;  %v59_v29 = vld [vmem:[%s1787_s1 + $0x8] sm:$0xff]  ;;  %v1431_v33 = vld [vmem:[#allocation2 + $0x30] sm:$0xff]  }
  0x1a   :  { %v1586_v30 = vpack.c.bf16 %v59_v29, %v58_v28  ;;  %v1429_v31 = vld [vmem:[#allocation2 + $0x20] sm:$0xff]   ;;  %v1430_v32 = vld [vmem:[#allocation2 + $0x28] sm:$0xff]   ;;  %v1432_v34 = vld [vmem:[#allocation2 + $0x38] sm:$0xff]  }
  0x1b   :  { %v1433_v35 = vld [vmem:[#allocation2 + $0x40] sm:$0xff]   ;;  %v1434_v36 = vld [vmem:[#allocation2 + $0x48] sm:$0xff]   ;;  %v60_v61 = vld [vmem:[%s1787_s1 + $0x10] sm:$0xff] }
  0x1c   :  { %1221 = vmatpush3.bf16.msra.mxu0 %v1427_v2  ;;  %1256 = vmatprep.mubr.bf16.mxu1 %v1586_v30  ;;  %v61_v62 = vld [vmem:[%s1787_s1 + $0x18] sm:$0xff]  ;;  %v62_v63 = vld [vmem:[%s1787_s1 + $0x20] sm:$0xff]  ;;  %v63_v0 = vld [vmem:[%s1787_s1 + $0x28] sm:$0xff] }
  0x1d   :  { %1222 = vmatprep.subr.bf16.mxu0 %v1428_v6  ;;  %v1601_v1 = vpack.c.bf16 %v61_v62, %v60_v61  ;;  %v1603_v2 = vpack.c.bf16 %v63_v0, %v62_v63  ;;  %v64_v3 = vld [vmem:[%s1787_s1 + $0x30] sm:$0xff]  ;;  %v65_v4 = vld [vmem:[%s1787_s1 + $0x38] sm:$0xff]  ;;  %v66_v5 = vld [vmem:[%s1787_s1 + $0x40] sm:$0xff] }
  0x1e   :  { %v1619_v7 = vpack.c.bf16 %v65_v4, %v64_v3  ;;  %v68_v9 = vld [vmem:[%s1787_s1 + $0x50] sm:$0xff]  ;;  %v69_v10 = vld [vmem:[%s1787_s1 + $0x58] sm:$0xff]  ;;  %v1438_v61 = vld [vmem:[#allocation2 + $0x68] sm:$0xff]  }
  0x1f   :  { %v1637_v13 = vpack.c.bf16 %v69_v10, %v68_v9  ;;  %v72_v15 = vld [vmem:[%s1787_s1 + $0x70] sm:$0xff]  ;;  %v73_v16 = vld [vmem:[%s1787_s1 + $0x78] sm:$0xff]  ;;  %v1441_v0 = vld [vmem:[#allocation2 + $0x80] sm:$0xff]  }
  0x20   :  { %1223 = vmatpush3.bf16.msra.mxu0 %v1428_v6  ;;  %v67_v6 = vld [vmem:[%s1787_s1 + $0x48] sm:$0xff]  ;;  %v1436_v19 = vld [vmem:[#allocation2 + $0x58] sm:$0xff]   ;;  %v1439_v62 = vld [vmem:[#allocation2 + $0x70] sm:$0xff]  }
  0x21   :  { %1272 = vmatprep.subr.bf16.mxu0 %v1429_v31  ;;  %v1621_v8 = vpack.c.bf16 %v67_v6, %v66_v5  ;;  %v1440_v63 = vld [vmem:[#allocation2 + $0x78] sm:$0xff]   ;;  %v1442_v3 = vld [vmem:[#allocation2 + $0x88] sm:$0xff]   ;;  %v1443_v4 = vld [vmem:[#allocation2 + $0x90] sm:$0xff]  }
  0x23   :  { %1225 = vmatmul.mubr.msk.bf16.vlgmr.msra.gmra.mrb[0].mxu0 %vm164_vm0, %v51_v11  ;;  %v70_v11 = vld [vmem:[%s1787_s1 + $0x60] sm:$0xff] }
  0x24   :  { %1228 = vmatprep.mubr.msk.bf16.mxu0 %vm164_vm0, %v52_v12  ;;  %1273 = vmatpush3.bf16.msra.mxu0 %v1429_v31  ;;  %v71_v12 = vld [vmem:[%s1787_s1 + $0x68] sm:$0xff] }
  0x25   :  { %1274 = vmatprep.subr.bf16.mxu0 %v1430_v32  ;;  %v1639_v14 = vpack.c.bf16 %v71_v12, %v70_v11 }
  0x28   :  { %1275 = vmatpush3.bf16.msra.mxu0 %v1430_v32 }
  0x29   :  { %1276 = vmatprep.subr.bf16.mxu0 %v1431_v33 }
  0x2b   :  { %1229 = vmatmul.mubr.msk.bf16.gmra.mrb[4].mxu0 %vm164_vm0, %v53_v17  ;;  %v1649_v17 = vpack.c.bf16 %v73_v16, %v72_v15 }
  0x2c   :  { %1232 = vmatprep.mubr.msk.bf16.mxu0 %vm164_vm0, %v54_v18  ;;  %1277 = vmatpush3.bf16.msra.mxu0 %v1431_v33  ;;  %v1435_v18 = vld [vmem:[#allocation2 + $0x50] sm:$0xff]  }
  0x2d   :  { %1278 = vmatprep.subr.bf16.mxu0 %v1432_v34 }
  0x30   :  { %1279 = vmatpush3.bf16.msra.mxu0 %v1432_v34 }
  0x31   :  { %1280 = vmatprep.subr.bf16.mxu0 %v1433_v35 }
  0x33   :  { %1233 = vmatmul.mubr.msk.bf16.gmra.mrb[8].mxu0 %vm164_vm0, %v55_v23 }
  0x34   :  { %1236 = vmatprep.mubr.msk.bf16.mxu0 %vm164_vm0, %v56_v24  ;;  %1281 = vmatpush3.bf16.msra.mxu0 %v1433_v35 }
  0x35   :  { %1282 = vmatprep.subr.bf16.mxu0 %v1434_v36 }
  0x38   :  { %1283 = vmatpush3.bf16.msra.mxu0 %v1434_v36 }
  0x39   :  { %1284 = vmatprep.subr.bf16.mxu0 %v1435_v18 }
  0x3b   :  { %1237 = vmatmul.mubr.msk.bf16.gmra.mrb[12].mxu0 %vm164_vm0, %v57_v27 }
  0x3c   :  { %1285 = vmatpush3.bf16.msra.mxu0 %v1435_v18 }
  0x3d   :  { %1286 = vmatprep.subr.bf16.mxu0 %v1436_v19 }
  0x40   :  { %1287 = vmatpush3.bf16.msra.mxu0 %v1436_v19 }
  0xf6   :  { %v1226_v37 = vpop.f32.mrb[0].mxu0 }
  0xf7   :  { %v223_v38 = vpop.f32.mrb[1].mxu0 }
  0xf8   :  { %v1227_v39 = vpop.f32.mrb[2].mxu0 }
  0xf9   :  { %v287_v40 = vpack.c.bf16 %v1227_v39, %v1226_v37  ;;  %v226_v41 = vpop.f32.mrb[3].mxu0 }
  0xfa   :  { %v286_v42 = vpack.c.bf16 %v226_v41, %v223_v38 }
  0xfc   :  { %1240 = vmatprep.subr.bf16.mxu1 %v286_v42 }
  0xfd   :  { %1241 = vmatpush3.bf16.msra.mxu1 %v286_v42 }
  0xfe   :  { %v1230_v43 = vpop.f32.mrb[4].mxu0  ;;  %1242 = vmatprep.subr.bf16.mxu1 %v287_v40 }
  0xff   :  { %v239_v44 = vpop.f32.mrb[5].mxu0 }
 0x100   :  { %v1231_v45 = vpop.f32.mrb[6].mxu0 }
 0x101   :  { %v289_v46 = vpack.c.bf16 %v1231_v45, %v1230_v43  ;;  %v242_v47 = vpop.f32.mrb[7].mxu0  ;;  %1243 = vmatpush3.bf16.msra.mxu1 %v287_v40 }
 0x102   :  { %v288_v48 = vpack.c.bf16 %v242_v47, %v239_v44 }
 0x104   :  { %1244 = vmatprep.subr.bf16.mxu1 %v288_v48 }
 0x105   :  { %1245 = vmatpush3.bf16.msra.mxu1 %v288_v48 }
 0x106   :  { %v1234_v49 = vpop.f32.mrb[8].mxu0  ;;  %1246 = vmatprep.subr.bf16.mxu1 %v289_v46 }
 0x107   :  { %v255_v50 = vpop.f32.mrb[9].mxu0 }
 0x108   :  { %v1235_v51 = vpop.f32.mrb[10].mxu0 }
 0x109   :  { %v291_v52 = vpack.c.bf16 %v1235_v51, %v1234_v49  ;;  %v258_v53 = vpop.f32.mrb[11].mxu0  ;;  %1247 = vmatpush3.bf16.msra.mxu1 %v289_v46 }
 0x10a   :  { %v290_v54 = vpack.c.bf16 %v258_v53, %v255_v50 }
 0x10c   :  { %1248 = vmatprep.subr.bf16.mxu1 %v290_v54 }
 0x10d   :  { %1249 = vmatpush3.bf16.msra.mxu1 %v290_v54 }
 0x10e   :  { %v1238_v55 = vpop.f32.mrb[12].mxu0  ;;  %1250 = vmatprep.subr.bf16.mxu1 %v291_v52 }
 0x10f   :  { %v271_v56 = vpop.f32.mrb[13].mxu0 }
 0x110   :  { %v1239_v57 = vpop.f32.mrb[14].mxu0 }
 0x111   :  { %v293_v58 = vpack.c.bf16 %v1239_v57, %v1238_v55  ;;  %v274_v59 = vpop.f32.mrb[15].mxu0  ;;  %1251 = vmatpush3.bf16.msra.mxu1 %v291_v52 }
 0x112   :  { %v292_v60 = vpack.c.bf16 %v274_v59, %v271_v56 }
 0x114   :  { %1252 = vmatprep.subr.bf16.mxu1 %v292_v60 }
 0x115   :  { %1253 = vmatpush3.bf16.msra.mxu1 %v292_v60  ;;  %v1437_v60 = vld [vmem:[#allocation2 + $0x60] sm:$0xff]  }
 0x116   :  { %1254 = vmatprep.subr.bf16.mxu1 %v293_v58  ;;  %1336 = vmatprep.subr.bf16.mxu0 %v1437_v60 }
 0x119   :  { %1255 = vmatpush3.bf16.msra.mxu1 %v293_v58 }
 0x11c   :  { %1257 = vmatmul.mubr.bf16.vlgmr.msra.gmra.mrb[0].mxu1 %v1601_v1 }
 0x11d   :  { %1260 = vmatprep.mubr.bf16.mxu1 %v1603_v2 }
 0x124   :  { %1261 = vmatmul.mubr.bf16.gmra.mrb[4].mxu1 %v1619_v7 }
 0x125   :  { %1264 = vmatprep.mubr.bf16.mxu1 %v1621_v8 }
 0x12c   :  { %1265 = vmatmul.mubr.bf16.gmra.mrb[8].mxu1 %v1637_v13 }
 0x12d   :  { %1268 = vmatprep.mubr.bf16.mxu1 %v1639_v14 }
 0x134   :  { %1269 = vmatmul.mubr.bf16.gmra.mrb[12].mxu1 %v1649_v17 }
 0x135   :  { %1320 = vmatprep.mubr.bf16.mxu1 %v1586_v30 }
 0x1ef   :  { %v1258_v20 = vpop.f32.mrb[0].mxu1 }
 0x1f0   :  { %v328_v21 = vpop.f32.mrb[1].mxu1  ;;  %v393_v23 = vmax.f32 %v1258_v20, 0.0 }
 0x1f1   :  { %v1259_v22 = vpop.f32.mrb[2].mxu1  ;;  %v391_v26 = vmax.f32 %v328_v21, 0.0 }
 0x1f2   :  { %v394_v24 = vmax.f32 %v1259_v22, 0.0  ;;  %v331_v25 = vpop.f32.mrb[3].mxu1 }
 0x1f3   :  { %v392_v27 = vmax.f32 %v331_v25, 0.0 }
 0x1f4   :  { %v408_v28 = vpack.c.bf16 %v394_v24, %v393_v23 }
 0x1f5   :  { %v407_v29 = vpack.c.bf16 %v392_v27, %v391_v26 }
 0x1f7   :  { %v1262_v31 = vpop.f32.mrb[4].mxu1  ;;  %1288 = vmatprep.mubr.bf16.mxu0 %v407_v29 }
 0x1f8   :  { %v344_v32 = vpop.f32.mrb[5].mxu1  ;;  %1289 = vmatmul.mubr.bf16.vlgmr.msra.gmra.mrb[16].mxu0 %v408_v28  ;;  %v397_v33 = vmax.f32 %v1262_v31, 0.0 }
 0x1f9   :  { %v1263_v30 = vpop.f32.mrb[6].mxu1  ;;  %v395_v36 = vmax.f32 %v344_v32, 0.0  ;;  %1337 = vmatpush3.bf16.msra.mxu0 %v1437_v60  ;;  %v1480_v60 = vmov 0.0  }
 0x1fa   :  { %v398_v34 = vmax.f32 %v1263_v30, 0.0  ;;  %v347_v35 = vpop.f32.mrb[7].mxu1  ;;  %1338 = vmatprep.subr.bf16.mxu0 %v1438_v61 }
 0x1fb   :  { %v396_v37 = vmax.f32 %v347_v35, 0.0  ;;  %v1445_v35 = vld [vmem:[#allocation2 + $0xa0] sm:$0xff]  }
 0x1fc   :  { %v410_v38 = vpack.c.bf16 %v398_v34, %v397_v33  ;;  %v1444_v34 = vld [vmem:[#allocation2 + $0x98] sm:$0xff]  }
 0x1fd   :  { %v409_v39 = vpack.c.bf16 %v396_v37, %v395_v36  ;;  %1339 = vmatpush3.bf16.msra.mxu0 %v1438_v61  ;;  %v1713_v61 = vld [vmem:[%s1789_s3] ss:$0 sm:$0xff] }
 0x1fe   :  { %1340 = vmatprep.subr.bf16.mxu0 %v1439_v62 }
 0x1ff   :  { %v1266_v40 = vpop.f32.mrb[8].mxu1  ;;  %1292 = vmatprep.mubr.bf16.mxu0 %v409_v39 }
 0x200   :  { %v360_v41 = vpop.f32.mrb[9].mxu1  ;;  %1293 = vmatmul.mubr.bf16.gmra.mrb[20].mxu0 %v410_v38  ;;  %v401_v43 = vmax.f32 %v1266_v40, 0.0  ;;  %v1447_v38 = vld [vmem:[#allocation2 + $0xb0] sm:$0xff]  }
 0x201   :  { %v1267_v42 = vpop.f32.mrb[10].mxu1  ;;  %v399_v46 = vmax.f32 %v360_v41, 0.0  ;;  %1341 = vmatpush3.bf16.msra.mxu0 %v1439_v62 }
 0x202   :  { %v402_v44 = vmax.f32 %v1267_v42, 0.0  ;;  %v363_v45 = vpop.f32.mrb[11].mxu1  ;;  %1342 = vmatprep.subr.bf16.mxu0 %v1440_v63 }
 0x203   :  { %v400_v47 = vmax.f32 %v363_v45, 0.0 }
 0x204   :  { %v412_v48 = vpack.c.bf16 %v402_v44, %v401_v43  ;;  %v1448_v43 = vld [vmem:[#allocation2 + $0xb8] sm:$0xff]  }
 0x205   :  { %v411_v49 = vpack.c.bf16 %v400_v47, %v399_v46  ;;  %1343 = vmatpush3.bf16.msra.mxu0 %v1440_v63  ;;  %v1449_v46 = vld [vmem:[#allocation2 + $0xc0] sm:$0xff]  }
 0x206   :  { %1344 = vmatprep.subr.bf16.mxu0 %v1441_v0 }
 0x207   :  { %v1270_v50 = vpop.f32.mrb[12].mxu1  ;;  %1296 = vmatprep.mubr.bf16.mxu0 %v411_v49 }
 0x208   :  { %v376_v51 = vpop.f32.mrb[13].mxu1  ;;  %1297 = vmatmul.mubr.bf16.gmra.mrb[24].mxu0 %v412_v48  ;;  %v405_v53 = vmax.f32 %v1270_v50, 0.0 }
 0x209   :  { %v1271_v52 = vpop.f32.mrb[14].mxu1  ;;  %v403_v56 = vmax.f32 %v376_v51, 0.0  ;;  %1345 = vmatpush3.bf16.msra.mxu0 %v1441_v0  ;;  %v1450_v51 = vld [vmem:[#allocation2 + $0xc8] sm:$0xff]  }
 0x20a   :  { %v406_v54 = vmax.f32 %v1271_v52, 0.0  ;;  %v379_v55 = vpop.f32.mrb[15].mxu1  ;;  %1346 = vmatprep.subr.bf16.mxu0 %v1442_v3 }
 0x20b   :  { %v404_v57 = vmax.f32 %v379_v55, 0.0 }
 0x20c   :  { %v414_v58 = vpack.c.bf16 %v406_v54, %v405_v53 }
 0x20d   :  { %v413_v59 = vpack.c.bf16 %v404_v57, %v403_v56  ;;  %1347 = vmatpush3.bf16.msra.mxu0 %v1442_v3 }
 0x20e   :  { %1348 = vmatprep.subr.bf16.mxu0 %v1443_v4 }
 0x20f   :  { %1300 = vmatprep.mubr.bf16.mxu0 %v413_v59  ;;  %v1452_v59 = vld [vmem:[#allocation2 + $0xd8] sm:$0xff]  }
 0x210   :  { %1301 = vmatmul.mubr.bf16.gmra.mrb[28].mxu0 %v414_v58  ;;  %v1451_v58 = vld [vmem:[#allocation2 + $0xd0] sm:$0xff]  }
 0x211   :  { %1349 = vmatpush3.bf16.msra.mxu0 %v1443_v4 }
 0x212   :  { %1350 = vmatprep.subr.bf16.mxu0 %v1444_v34 }
 0x215   :  { %1351 = vmatpush3.bf16.msra.mxu0 %v1444_v34 }
 0x216   :  { %1388 = vmatprep.subr.bf16.mxu0 %v1445_v35 }
 0x2cb   :  { %v1290_v5 = vpop.f32.mrb[16].mxu0 }
 0x2cc   :  { %v497_v6 = vpop.f32.mrb[17].mxu0 }
 0x2cd   :  { %v1291_v9 = vpop.f32.mrb[18].mxu0 }
 0x2ce   :  { %v561_v10 = vpack.c.bf16 %v1291_v9, %v1290_v5  ;;  %v500_v11 = vpop.f32.mrb[19].mxu0 }
 0x2cf   :  { %v560_v12 = vpack.c.bf16 %v500_v11, %v497_v6 }
 0x2d1   :  { %1304 = vmatprep.subr.bf16.mxu1 %v560_v12 }
 0x2d2   :  { %1305 = vmatpush3.bf16.msra.mxu1 %v560_v12 }
 0x2d3   :  { %v1294_v15 = vpop.f32.mrb[20].mxu0  ;;  %1306 = vmatprep.subr.bf16.mxu1 %v561_v10 }
 0x2d4   :  { %v513_v16 = vpop.f32.mrb[21].mxu0 }
 0x2d5   :  { %v1295_v18 = vpop.f32.mrb[22].mxu0 }
 0x2d6   :  { %v563_v19 = vpack.c.bf16 %v1295_v18, %v1294_v15  ;;  %v516_v20 = vpop.f32.mrb[23].mxu0  ;;  %1307 = vmatpush3.bf16.msra.mxu1 %v561_v10 }
 0x2d7   :  { %v562_v21 = vpack.c.bf16 %v516_v20, %v513_v16 }
 0x2d9   :  { %1308 = vmatprep.subr.bf16.mxu1 %v562_v21 }
 0x2da   :  { %1309 = vmatpush3.bf16.msra.mxu1 %v562_v21 }
 0x2db   :  { %v1298_v22 = vpop.f32.mrb[24].mxu0  ;;  %1310 = vmatprep.subr.bf16.mxu1 %v563_v19 }
 0x2dc   :  { %v529_v23 = vpop.f32.mrb[25].mxu0 }
 0x2dd   :  { %v1299_v24 = vpop.f32.mrb[26].mxu0 }
 0x2de   :  { %v565_v25 = vpack.c.bf16 %v1299_v24, %v1298_v22  ;;  %v532_v26 = vpop.f32.mrb[27].mxu0  ;;  %1311 = vmatpush3.bf16.msra.mxu1 %v563_v19 }
 0x2df   :  { %v564_v27 = vpack.c.bf16 %v532_v26, %v529_v23 }
 0x2e1   :  { %1312 = vmatprep.subr.bf16.mxu1 %v564_v27 }
 0x2e2   :  { %1313 = vmatpush3.bf16.msra.mxu1 %v564_v27 }
 0x2e3   :  { %v1302_v28 = vpop.f32.mrb[28].mxu0  ;;  %1314 = vmatprep.subr.bf16.mxu1 %v565_v25 }
 0x2e4   :  { %v545_v29 = vpop.f32.mrb[29].mxu0 }
 0x2e5   :  { %v1303_v31 = vpop.f32.mrb[30].mxu0 }
 0x2e6   :  { %v567_v32 = vpack.c.bf16 %v1303_v31, %v1302_v28  ;;  %v548_v30 = vpop.f32.mrb[31].mxu0  ;;  %1315 = vmatpush3.bf16.msra.mxu1 %v565_v25 }
 0x2e7   :  { %v566_v33 = vpack.c.bf16 %v548_v30, %v545_v29 }
 0x2e9   :  { %1316 = vmatprep.subr.bf16.mxu1 %v566_v33 }
 0x2ea   :  { %1317 = vmatpush3.bf16.msra.mxu1 %v566_v33 }
 0x2eb   :  { %1318 = vmatprep.subr.bf16.mxu1 %v567_v32 }
 0x2ee   :  { %1319 = vmatpush3.bf16.msra.mxu1 %v567_v32 }
 0x2ef   :  { %1368 = vmatprep.subr.bf16.mxu1 %v1480_v60 }
 0x2f1   :  { %1321 = vmatmul.mubr.bf16.vlgmr.msra.gmra.mrb[16].mxu1 %v1601_v1 }
 0x2f2   :  { %1324 = vmatprep.mubr.bf16.mxu1 %v1603_v2 }
 0x2f9   :  { %1325 = vmatmul.mubr.bf16.gmra.mrb[20].mxu1 %v1619_v7 }
 0x2fa   :  { %1328 = vmatprep.mubr.bf16.mxu1 %v1621_v8 }
 0x301   :  { %1329 = vmatmul.mubr.bf16.gmra.mrb[24].mxu1 %v1637_v13 }
 0x302   :  { %1332 = vmatprep.mubr.bf16.mxu1 %v1639_v14  ;;  %v1446_v14 = vld [vmem:[#allocation2 + $0xa8] sm:$0xff]  }
 0x309   :  { %1333 = vmatmul.mubr.bf16.gmra.mrb[28].mxu1 %v1649_v17 }
 0x30a   :  { %1384 = vmatprep.mubr.msk.bf16.mxu1 %vm1481_vm1, %v1480_v60 }
 0x3c4   :  { %v1322_v36 = vpop.f32.mrb[16].mxu1 }
 0x3c5   :  { %667 = vst [vmem:[%s1791_s5 + $0x10] sm:$0xff] %v1322_v36  ;;  %v602_v1 = vpop.f32.mrb[17].mxu1 }
 0x3c6   :  { %665 = vst [vmem:[%s1791_s5] sm:$0xff] %v602_v1  ;;  %v1323_v2 = vpop.f32.mrb[18].mxu1 }
 0x3c7   :  { %668 = vst [vmem:[%s1791_s5 + $0x18] sm:$0xff] %v1323_v2  ;;  %v682_v7 = vpack.c.bf16 %v1323_v2, %v1322_v36  ;;  %v605_v8 = vpop.f32.mrb[19].mxu1 }
 0x3c8   :  { %666 = vst [vmem:[%s1791_s5 + $0x8] sm:$0xff] %v605_v8  ;;  %v681_v13 = vpack.c.bf16 %v605_v8, %v602_v1 }
 0x3ca   :  { %1352 = vmatprep.mubr.bf16.mxu0 %v681_v13 }
 0x3cb   :  { %1353 = vmatmul.mubr.bf16.vlgmr.msra.gmra.mrb[32].mxu0 %v682_v7 }
 0x3cc   :  { %v1326_v17 = vpop.f32.mrb[20].mxu1  ;;  %1389 = vmatpush3.bf16.msra.mxu0 %v1445_v35 }
 0x3cd   :  { %671 = vst [vmem:[%s1791_s5 + $0x30] sm:$0xff] %v1326_v17  ;;  %v618_v37 = vpop.f32.mrb[21].mxu1  ;;  %1390 = vmatprep.subr.bf16.mxu0 %v1446_v14 }
 0x3ce   :  { %669 = vst [vmem:[%s1791_s5 + $0x20] sm:$0xff] %v618_v37  ;;  %v1327_v39 = vpop.f32.mrb[22].mxu1 }
 0x3cf   :  { %672 = vst [vmem:[%s1791_s5 + $0x38] sm:$0xff] %v1327_v39  ;;  %v684_v40 = vpack.c.bf16 %v1327_v39, %v1326_v17  ;;  %v621_v41 = vpop.f32.mrb[23].mxu1 }
 0x3d0   :  { %670 = vst [vmem:[%s1791_s5 + $0x28] sm:$0xff] %v621_v41  ;;  %v683_v42 = vpack.c.bf16 %v621_v41, %v618_v37  ;;  %1391 = vmatpush3.bf16.msra.mxu0 %v1446_v14 }
 0x3d1   :  { %1392 = vmatprep.subr.bf16.mxu0 %v1447_v38 }
 0x3d2   :  { %1356 = vmatprep.mubr.bf16.mxu0 %v683_v42 }
 0x3d3   :  { %1357 = vmatmul.mubr.bf16.gmra.mrb[36].mxu0 %v684_v40 }
 0x3d4   :  { %v1330_v44 = vpop.f32.mrb[24].mxu1  ;;  %1393 = vmatpush3.bf16.msra.mxu0 %v1447_v38 }
 0x3d5   :  { %675 = vst [vmem:[%s1791_s5 + $0x50] sm:$0xff] %v1330_v44  ;;  %v634_v45 = vpop.f32.mrb[25].mxu1  ;;  %1394 = vmatprep.subr.bf16.mxu0 %v1448_v43 }
 0x3d6   :  { %673 = vst [vmem:[%s1791_s5 + $0x40] sm:$0xff] %v634_v45  ;;  %v1331_v47 = vpop.f32.mrb[26].mxu1 }
 0x3d7   :  { %676 = vst [vmem:[%s1791_s5 + $0x58] sm:$0xff] %v1331_v47  ;;  %v686_v48 = vpack.c.bf16 %v1331_v47, %v1330_v44  ;;  %v637_v49 = vpop.f32.mrb[27].mxu1 }
 0x3d8   :  { %674 = vst [vmem:[%s1791_s5 + $0x48] sm:$0xff] %v637_v49  ;;  %v685_v50 = vpack.c.bf16 %v637_v49, %v634_v45  ;;  %1395 = vmatpush3.bf16.msra.mxu0 %v1448_v43 }
 0x3d9   :  { %1396 = vmatprep.subr.bf16.mxu0 %v1449_v46 }
 0x3da   :  { %1360 = vmatprep.mubr.bf16.mxu0 %v685_v50 }
 0x3db   :  { %1361 = vmatmul.mubr.bf16.gmra.mrb[40].mxu0 %v686_v48 }
 0x3dc   :  { %v1334_v52 = vpop.f32.mrb[28].mxu1  ;;  %1397 = vmatpush3.bf16.msra.mxu0 %v1449_v46 }
 0x3dd   :  { %679 = vst [vmem:[%s1791_s5 + $0x70] sm:$0xff] %v1334_v52  ;;  %v650_v53 = vpop.f32.mrb[29].mxu1  ;;  %1398 = vmatprep.subr.bf16.mxu0 %v1450_v51 }
 0x3de   :  { %677 = vst [vmem:[%s1791_s5 + $0x60] sm:$0xff] %v650_v53  ;;  %v1335_v54 = vpop.f32.mrb[30].mxu1 }
 0x3df   :  { %680 = vst [vmem:[%s1791_s5 + $0x78] sm:$0xff] %v1335_v54  ;;  %v688_v55 = vpack.c.bf16 %v1335_v54, %v1334_v52  ;;  %v653_v56 = vpop.f32.mrb[31].mxu1  ;;  %v138_v54 = vld [vmem:[#allocation2 + $0xe0] sm:$0x1] }
 0x3e0   :  { %678 = vst [vmem:[%s1791_s5 + $0x68] sm:$0xff] %v653_v56  ;;  %v687_v57 = vpack.c.bf16 %v653_v56, %v650_v53  ;;  %1399 = vmatpush3.bf16.msra.mxu0 %v1450_v51 }
 0x3e1   :  { %1400 = vmatprep.subr.bf16.mxu0 %v1451_v58 }
 0x3e2   :  { %1364 = vmatprep.mubr.bf16.mxu0 %v687_v57 }
 0x3e3   :  { %1365 = vmatmul.mubr.bf16.gmra.mrb[44].mxu0 %v688_v55 }
 0x3e4   :  { %1401 = vmatpush3.bf16.msra.mxu0 %v1451_v58 }
 0x3e5   :  { %1402 = vmatprep.subr.bf16.mxu0 %v1452_v59 }
 0x3e8   :  { %1403 = vmatpush3.bf16.msra.mxu0 %v1452_v59 }
 0x49e   :  { %v1354_v62 = vpop.f32.mrb[32].mxu0 }
 0x49f   :  { %v786_v63 = vadd.f32 %v1354_v62, %v1713_v61  ;;  %v777_v0 = vpop.f32.mrb[33].mxu0 }
 0x4a0   :  { %v778_v3 = vadd.f32 %v1713_v61, %v777_v0  ;;  %v1355_v4 = vpop.f32.mrb[34].mxu0 }
 0x4a1   :  { %v789_v5 = vadd.f32 %v1355_v4, %v1713_v61  ;;  %v780_v6 = vpop.f32.mrb[35].mxu0  ;;  %v842_v10 = vmax.f32 %v786_v63, 0.0 }
 0x4a2   :  { %v781_v9 = vadd.f32 %v1713_v61, %v780_v6  ;;  %v840_v12 = vmax.f32 %v778_v3, 0.0 }
 0x4a3   :  { %v843_v11 = vmax.f32 %v789_v5, 0.0 }
 0x4a4   :  { %v841_v15 = vmax.f32 %v781_v9, 0.0 }
 0x4a5   :  { %v857_v16 = vpack.c.bf16 %v843_v11, %v842_v10 }
 0x4a6   :  { %v856_v18 = vpack.c.bf16 %v841_v15, %v840_v12  ;;  %v1358_v19 = vpop.f32.mrb[36].mxu0 }
 0x4a7   :  { %v802_v20 = vadd.f32 %v1358_v19, %v1713_v61  ;;  %v793_v21 = vpop.f32.mrb[37].mxu0 }
 0x4a8   :  { %v794_v22 = vadd.f32 %v1713_v61, %v793_v21  ;;  %v1359_v23 = vpop.f32.mrb[38].mxu0  ;;  %1369 = vmatpush3.bf16.xpose.msra.mxu1 %v856_v18  ;;  %1404 = vmatprep.mubr.bf16.mxu0 %v856_v18 }
 0x4a9   :  { %v846_v24 = vmax.f32 %v802_v20, 0.0  ;;  %v805_v25 = vadd.f32 %v1359_v23, %v1713_v61  ;;  %v796_v26 = vpop.f32.mrb[39].mxu0  ;;  %1405 = vmatmul.mubr.bf16.vlgmr.msra.gmra.mrb[48].mxu0 %v857_v16  ;;  %1370 = vmatprep.subr.bf16.mxu1 %v1480_v60 }
 0x4aa   :  { %v844_v27 = vmax.f32 %v794_v22, 0.0  ;;  %v797_v28 = vadd.f32 %v1713_v61, %v796_v26 }
 0x4ab   :  { %v847_v29 = vmax.f32 %v805_v25, 0.0 }
 0x4ac   :  { %v845_v31 = vmax.f32 %v797_v28, 0.0 }
 0x4ad   :  { %v859_v32 = vpack.c.bf16 %v847_v29, %v846_v24 }
 0x4ae   :  { %v858_v30 = vpack.c.bf16 %v845_v31, %v844_v27  ;;  %v1362_v33 = vpop.f32.mrb[40].mxu0 }
 0x4af   :  { %v818_v34 = vadd.f32 %v1362_v33, %v1713_v61  ;;  %v809_v35 = vpop.f32.mrb[41].mxu0 }
 0x4b0   :  { %1371 = vmatpush3.bf16.xpose.msra.mxu1 %v857_v16  ;;  %1408 = vmatprep.mubr.bf16.mxu0 %v858_v30  ;;  %v810_v36 = vadd.f32 %v1713_v61, %v809_v35  ;;  %v1363_v1 = vpop.f32.mrb[42].mxu0 }
 0x4b1   :  { %1409 = vmatmul.mubr.bf16.gmra.mrb[52].mxu0 %v859_v32  ;;  %v850_v2 = vmax.f32 %v818_v34, 0.0  ;;  %v821_v7 = vadd.f32 %v1363_v1, %v1713_v61  ;;  %v812_v8 = vpop.f32.mrb[43].mxu0  ;;  %1372 = vmatprep.subr.bf16.mxu1 %v1480_v60 }
 0x4b2   :  { %v848_v13 = vmax.f32 %v810_v36, 0.0  ;;  %v813_v14 = vadd.f32 %v1713_v61, %v812_v8 }
 0x4b3   :  { %v851_v17 = vmax.f32 %v821_v7, 0.0 }
 0x4b4   :  { %v849_v37 = vmax.f32 %v813_v14, 0.0 }
 0x4b5   :  { %v861_v38 = vpack.c.bf16 %v851_v17, %v850_v2 }
 0x4b6   :  { %v860_v39 = vpack.c.bf16 %v849_v37, %v848_v13  ;;  %v1366_v40 = vpop.f32.mrb[44].mxu0 }
 0x4b7   :  { %v834_v41 = vadd.f32 %v1366_v40, %v1713_v61  ;;  %v825_v42 = vpop.f32.mrb[45].mxu0 }
 0x4b8   :  { %1373 = vmatpush3.bf16.xpose.msra.mxu1 %v858_v30  ;;  %1412 = vmatprep.mubr.bf16.mxu0 %v860_v39  ;;  %v826_v43 = vadd.f32 %v1713_v61, %v825_v42  ;;  %v1367_v44 = vpop.f32.mrb[46].mxu0 }
 0x4b9   :  { %1374 = vmatprep.subr.bf16.mxu1 %v1480_v60  ;;  %1413 = vmatmul.mubr.bf16.gmra.mrb[56].mxu0 %v861_v38  ;;  %v854_v45 = vmax.f32 %v834_v41, 0.0  ;;  %v837_v46 = vadd.f32 %v1367_v44, %v1713_v61  ;;  %v828_v47 = vpop.f32.mrb[47].mxu0 }
 0x4ba   :  { %v852_v48 = vmax.f32 %v826_v43, 0.0  ;;  %v829_v49 = vadd.f32 %v1713_v61, %v828_v47 }
 0x4bb   :  { %v855_v50 = vmax.f32 %v837_v46, 0.0 }
 0x4bc   :  { %v853_v51 = vmax.f32 %v829_v49, 0.0 }
 0x4bd   :  { %v863_v52 = vpack.c.bf16 %v855_v50, %v854_v45 }
 0x4be   :  { %v862_v53 = vpack.c.bf16 %v853_v51, %v852_v48 }
 0x4c0   :  { %1375 = vmatpush3.bf16.xpose.msra.mxu1 %v859_v32  ;;  %1416 = vmatprep.mubr.bf16.mxu0 %v862_v53 }
 0x4c1   :  { %1376 = vmatprep.subr.bf16.mxu1 %v1480_v60  ;;  %1417 = vmatmul.mubr.bf16.gmra.mrb[60].mxu0 %v863_v52 }
 0x4c8   :  { %1377 = vmatpush3.bf16.xpose.msra.mxu1 %v860_v39 }
 0x4c9   :  { %1378 = vmatprep.subr.bf16.mxu1 %v1480_v60 }
 0x4d0   :  { %1379 = vmatpush3.bf16.xpose.msra.mxu1 %v861_v38 }
 0x4d1   :  { %1380 = vmatprep.subr.bf16.mxu1 %v1480_v60 }
 0x4d8   :  { %1381 = vmatpush3.bf16.xpose.msra.mxu1 %v862_v53 }
 0x4d9   :  { %1382 = vmatprep.subr.bf16.mxu1 %v1480_v60  ;;  %v904_v60 = vlaneseq }
 0x4db   :  { %v905_v12 = vshrl.u32 %v904_v60, 7 }
 0x4dd   :  { %v906_v15 = vsub.s32 0, %v905_v12 }
 0x4e0   :  { %1383 = vmatpush3.bf16.xpose.msra.mxu1 %v863_v52 }
 0x4e7   :  { %1385 = vmatmul.mubr.bf16.vlgmr.msra.gmra.mrb[32].mxu1 %v138_v54 }
 0x57c   :  { %v1406_v55 = vpop.f32.mrb[48].mxu0 }
 0x57d   :  { %v990_v56 = vpop.f32.mrb[49].mxu0 }
 0x57e   :  { %v1407_v57 = vpop.f32.mrb[50].mxu0 }
 0x57f   :  { %v993_v58 = vpop.f32.mrb[51].mxu0 }
 0x584   :  { %v1410_v59 = vpop.f32.mrb[52].mxu0 }
 0x585   :  { %v1006_v61 = vpop.f32.mrb[53].mxu0 }
 0x586   :  { %v1411_v62 = vpop.f32.mrb[54].mxu0 }
 0x587   :  { %v1009_v63 = vpop.f32.mrb[55].mxu0 }
 0x58c   :  { %v1414_v0 = vpop.f32.mrb[56].mxu0 }
 0x58d   :  { %v1022_v3 = vpop.f32.mrb[57].mxu0 }
 0x58e   :  { %v1415_v4 = vpop.f32.mrb[58].mxu0 }
 0x58f   :  { %v1025_v5 = vpop.f32.mrb[59].mxu0 }
 0x594   :  { %v1418_v6 = vpop.f32.mrb[60].mxu0 }
 0x595   :  { %v1038_v9 = vpop.f32.mrb[61].mxu0 }
 0x596   :  { %v1419_v10 = vpop.f32.mrb[62].mxu0 }
 0x597   :  { %v1041_v11 = vpop.f32.mrb[63].mxu0 }
 0x5ba   :  { %v898_v16 = vpop.f32.mrb[32].mxu1 }
 0x5bb   :  { %v907_v18 = vrot.slane %v898_v16, %v906_v15  ;;  %v1386_v19 = vpop.f32.mrb[33].mxu1 }
 0x5bc   :  { %v901_v20 = vpop.f32.mrb[34].mxu1 }
 0x5bd   :  { %v991_v21 = vadd.f32 %v990_v56, %v907_v18  ;;  %v999_v22 = vadd.f32 %v1406_v55, %v907_v18  ;;  %v994_v23 = vadd.f32 %v993_v58, %v907_v18  ;;  %v1002_v24 = vadd.f32 %v1407_v57, %v907_v18  ;;  %v1387_v25 = vpop.f32.mrb[35].mxu1 }
 0x5be   :  { %v1007_v26 = vadd.f32 %v1006_v61, %v907_v18  ;;  %v1015_v27 = vadd.f32 %v1410_v59, %v907_v18  ;;  %v1010_v28 = vadd.f32 %v1009_v63, %v907_v18  ;;  %v1018_v29 = vadd.f32 %v1411_v62, %v907_v18 }
 0x5bf   :  { %v1023_v31 = vadd.f32 %v1022_v3, %v907_v18  ;;  %v1031_v32 = vadd.f32 %v1414_v0, %v907_v18  ;;  %v1026_v30 = vadd.f32 %v1025_v5, %v907_v18  ;;  %v1034_v33 = vadd.f32 %v1415_v4, %v907_v18  ;;  %1053 = vst [vmem:[%s1790_s4] sm:$0xff] %v991_v21 }
 0x5c0   :  { %1054 = vst [vmem:[%s1790_s4 + $0x8] sm:$0xff] %v994_v23  ;;  %1055 = vst [vmem:[%s1790_s4 + $0x10] sm:$0xff] %v999_v22  ;;  %v1039_v34 = vadd.f32 %v1038_v9, %v907_v18  ;;  %v1047_v35 = vadd.f32 %v1418_v6, %v907_v18  ;;  %v1042_v36 = vadd.f32 %v1041_v11, %v907_v18 }
 0x5c1   :  { %1056 = vst [vmem:[%s1790_s4 + $0x18] sm:$0xff] %v1002_v24  ;;  %v1050_v1 = vadd.f32 %v1419_v10, %v907_v18  ;;  %1057 = vst [vmem:[%s1790_s4 + $0x20] sm:$0xff] %v1007_v26 }
 0x5c2   :  { %1058 = vst [vmem:[%s1790_s4 + $0x28] sm:$0xff] %v1010_v28  ;;  %1059 = vst [vmem:[%s1790_s4 + $0x30] sm:$0xff] %v1015_v27 }
 0x5c3   :  { %1060 = vst [vmem:[%s1790_s4 + $0x38] sm:$0xff] %v1018_v29  ;;  %1061 = vst [vmem:[%s1790_s4 + $0x40] sm:$0xff] %v1023_v31 }
 0x5c4   :  { %1062 = vst [vmem:[%s1790_s4 + $0x48] sm:$0xff] %v1026_v30  ;;  %1063 = vst [vmem:[%s1790_s4 + $0x50] sm:$0xff] %v1031_v32 }
 0x5c5   :  { %1064 = vst [vmem:[%s1790_s4 + $0x58] sm:$0xff] %v1034_v33  ;;  %1065 = vst [vmem:[%s1790_s4 + $0x60] sm:$0xff] %v1039_v34 }
 0x5c6   :  { %1066 = vst [vmem:[%s1790_s4 + $0x68] sm:$0xff] %v1042_v36  ;;  %1067 = vst [vmem:[%s1790_s4 + $0x70] sm:$0xff] %v1047_v35 }
 0x5c7   :  { %1068 = vst [vmem:[%s1790_s4 + $0x78] sm:$0xff] %v1050_v1 }
 0x5c8   :  { %1077 = vsyncpa [#allocation3], 1 }

</bundles_post_ra>
